<compile_context>
chip_gen: v5e
topology: v5e:2x2
jax: 0.10.0
libtpu: 0.0.40
codegen_flags: <defaults>
</compile_context>

<pallas_src>
import functools

import jax
import jax.numpy as jnp
import numpy as np
from jax.experimental import pallas as pl
from jax.experimental.pallas import tpu as pltpu


def _unet_block_kernel(x_ref, w1_ref, b1_ref, w2_ref, b2_ref, m_ref, o_ref, *, W):
    # x_ref : (Cin_p, H*W)      one image, channels on sublanes, spatial on lanes
    # w1_ref: (Cout_p, 9*Cin_p) conv1 weights, tap-major (kh, kw), channel-minor
    # b1_ref: (Cout_p, 1)
    # w2_ref: (Cout_p, 9*Cout_p)
    # b2_ref: (Cout_p, 1)
    # m_ref : (9, H*W)          {0,1} validity mask per tap (padding=1 semantics)
    # o_ref : (Cout_p, H*W)
    HW = x_ref.shape[-1]

    # Per-tap (lane shift, boundary mask) pairs; masks loaded once, reused for
    # both convolutions.  Tap order (dy, dx) row-major matches the weight packing.
    taps = []
    t = 0
    for dy in (-1, 0, 1):
        for dx in (-1, 0, 1):
            shift = (-(dy * W + dx)) % HW
            mask = None if (dy == 0 and dx == 0) else m_ref[t:t + 1, :]  # (1, HW)
            taps.append((shift, mask))
            t += 1

    def im2col(a):
        # a: (C, HW) -> (9*C, HW); shifts via XLU lane-roll, halo via mask.
        pieces = []
        for shift, mask in taps:
            p = a if shift == 0 else pltpu.roll(a, shift, 1)
            if mask is not None:
                p = p * mask
            pieces.append(p)
        return jnp.concatenate(pieces, axis=0)

    x = x_ref[...]

    # conv1: single matmul (Cout_p, 9*Cin_p) @ (9*Cin_p, HW) + bias + ReLU
    h = jax.lax.dot_general(w1_ref[...], im2col(x),
                            dimension_numbers=(((1,), (0,)), ((), ())),
                            preferred_element_type=jnp.float32)
    h = jnp.maximum(h + b1_ref[...], 0.0)                       # (Cout_p, HW)

    # conv2: single matmul (Cout_p, 9*Cout_p) @ (9*Cout_p, HW) + bias + ReLU
    y = jax.lax.dot_general(w2_ref[...], im2col(h),
                            dimension_numbers=(((1,), (0,)), ((), ())),
                            preferred_element_type=jnp.float32)
    o_ref[...] = jnp.maximum(y + b2_ref[...], 0.0).astype(o_ref.dtype)


def _round_up(n, m):
    return ((n + m - 1) // m) * m


def _tap_masks(H, W):
    """(9, H*W) float32 {0,1} masks implementing zero-padding=1 for a 3x3 conv."""
    m = np.ones((9, H, W), np.float32)
    t = 0
    for dy in (-1, 0, 1):
        for dx in (-1, 0, 1):
            if dy == -1:
                m[t, 0, :] = 0.0
            if dy == 1:
                m[t, H - 1, :] = 0.0
            if dx == -1:
                m[t, :, 0] = 0.0
            if dx == 1:
                m[t, :, W - 1] = 0.0
            t += 1
    return m.reshape(9, H * W)


def _pack_weights(w_oihw, cin_p, cout_p):
    """OIHW -> (cout_p, 9*cin_p), tap-major (kh, kw), input-channel-minor."""
    O, I, KH, KW = w_oihw.shape
    w = jnp.pad(w_oihw, ((0, cout_p - O), (0, cin_p - I), (0, 0), (0, 0)))
    return jnp.transpose(w, (0, 2, 3, 1)).reshape(cout_p, KH * KW * cin_p)


@jax.jit
def unet_conv_block(x_nchw, w1_oihw, b1, w2_oihw, b2):
    """x_nchw: (N, Cin, H, W) float32 -> (N, Cout, H, W) float32."""
    N, Cin, H, W = x_nchw.shape
    Cout = w1_oihw.shape[0]
    HW = H * W
    Cin_p = _round_up(Cin, 8)
    Cout_p = _round_up(Cout, 8)

    # NCHW -> (N, C, H*W): a free reshape (no transpose, no spatial pad).
    x = x_nchw.reshape(N, Cin, HW)
    if Cin_p != Cin:
        x = jnp.pad(x, ((0, 0), (0, Cin_p - Cin), (0, 0)))

    w1_mat = _pack_weights(w1_oihw, Cin_p, Cout_p)        # (Cout_p, 9*Cin_p)
    w2_mat = _pack_weights(w2_oihw, Cout_p, Cout_p)       # (Cout_p, 9*Cout_p)
    b1_col = jnp.pad(b1, (0, Cout_p - Cout)).reshape(Cout_p, 1)
    b2_col = jnp.pad(b2, (0, Cout_p - Cout)).reshape(Cout_p, 1)
    masks = jnp.asarray(_tap_masks(H, W))                 # (9, HW)

    out = pl.pallas_call(
        functools.partial(_unet_block_kernel, W=W),
        out_shape=jax.ShapeDtypeStruct((N, Cout_p, HW), jnp.float32),
        grid_spec=pltpu.PrefetchScalarGridSpec(
            num_scalar_prefetch=0,
            grid=(N,),
            in_specs=[
                pl.BlockSpec((pl.Squeezed(), Cin_p, HW), lambda n: (n, 0, 0)),
                pl.BlockSpec((Cout_p, 9 * Cin_p), lambda n: (0, 0)),
                pl.BlockSpec((Cout_p, 1), lambda n: (0, 0)),
                pl.BlockSpec((Cout_p, 9 * Cout_p), lambda n: (0, 0)),
                pl.BlockSpec((Cout_p, 1), lambda n: (0, 0)),
                pl.BlockSpec((9, HW), lambda n: (0, 0)),
            ],
            out_specs=pl.BlockSpec((pl.Squeezed(), Cout_p, HW),
                                   lambda n: (n, 0, 0)),
        ),
        compiler_params=pltpu.CompilerParams(
            dimension_semantics=("parallel",)),
    )(x, w1_mat, b1_col, w2_mat, b2_col, masks)

    # (N, Cout_p, H*W) -> (N, Cout, H, W): channel slice (no-op when Cout_p==Cout)
    # + free reshape back to NCHW.
    return out[:, :Cout, :].reshape(N, Cout, H, W)


def _reference_forward(x_nchw, w1, b1, w2, b2):
    """Plain-JAX reference matching the PyTorch module semantics (NCHW/OIHW)."""
    dn = ("NCHW", "OIHW", "NCHW")
    y = jax.lax.conv_general_dilated(x_nchw, w1, (1, 1), ((1, 1), (1, 1)),
                                     dimension_numbers=dn)
    y = jnp.maximum(y + b1[None, :, None, None], 0.0)
    y = jax.lax.conv_general_dilated(y, w2, (1, 1), ((1, 1), (1, 1)),
                                     dimension_numbers=dn)
    y = jnp.maximum(y + b2[None, :, None, None], 0.0)
    return y


if __name__ == "__main__":
    # Small shapes consistent with the module: UNetConvBlock(in_size=4, out_size=8)
    N, Cin, Cout, H, W = 2, 4, 8, 16, 16
    key = jax.random.PRNGKey(0)
    kx, k1, kb1, k2, kb2 = jax.random.split(key, 5)

    # Deterministic parameter init mimicking nn.Conv2d defaults (uniform +-1/sqrt(fan_in))
    bound1 = 1.0 / np.sqrt(Cin * 3 * 3)
    bound2 = 1.0 / np.sqrt(Cout * 3 * 3)
    w1 = jax.random.uniform(k1, (Cout, Cin, 3, 3), jnp.float32, -bound1, bound1)
    b1 = jax.random.uniform(kb1, (Cout,), jnp.float32, -bound1, bound1)
    w2 = jax.random.uniform(k2, (Cout, Cout, 3, 3), jnp.float32, -bound2, bound2)
    b2 = jax.random.uniform(kb2, (Cout,), jnp.float32, -bound2, bound2)

    x = jax.random.normal(kx, (N, Cin, H, W), jnp.float32)

    out = jax.block_until_ready(unet_conv_block(x, w1, b1, w2, b2))
    ref = jax.block_until_ready(_reference_forward(x, w1, b1, w2, b2))

    assert out.shape == (N, Cout, H, W), out.shape
    np.testing.assert_allclose(np.asarray(out), np.asarray(ref),
                               rtol=1e-4, atol=1e-4)
    print("KERNEL_OK")
</pallas_src>

<mosaic_0001>
module attributes {stable_mosaic.version = 11 : i64} {
  func.func @_unet_block_kernel(%arg0: i32, %arg1: memref<1x8x256xf32, #tpu.memory_space<vmem>>, %arg2: memref<8x72xf32, #tpu.memory_space<vmem>>, %arg3: memref<8x1xf32, #tpu.memory_space<vmem>>, %arg4: memref<8x72xf32, #tpu.memory_space<vmem>>, %arg5: memref<8x1xf32, #tpu.memory_space<vmem>>, %arg6: memref<9x256xf32, #tpu.memory_space<vmem>>, %arg7: memref<1x8x256xf32, #tpu.memory_space<vmem>>) attributes {dimension_semantics = [#tpu.dimension_semantics<parallel>], iteration_bounds = array<i64: 2>, scalar_prefetch = 0 : i64, scratch_operands = 0 : i64, tpu.core_type = #tpu.core_type<tc>, window_params = [{transform_indices = @transform_0, window_bounds = array<i64: 1, 8, 256>}, {pipeline_mode = #tpu.pipeline_mode<synchronous>, transform_indices = @transform_1, window_bounds = array<i64: 8, 72>}, {pipeline_mode = #tpu.pipeline_mode<synchronous>, transform_indices = @transform_2, window_bounds = array<i64: 8, 1>}, {pipeline_mode = #tpu.pipeline_mode<synchronous>, transform_indices = @transform_3, window_bounds = array<i64: 8, 72>}, {pipeline_mode = #tpu.pipeline_mode<synchronous>, transform_indices = @transform_4, window_bounds = array<i64: 8, 1>}, {pipeline_mode = #tpu.pipeline_mode<synchronous>, transform_indices = @transform_5, window_bounds = array<i64: 9, 256>}, {transform_indices = @transform_6, window_bounds = array<i64: 1, 8, 256>}]} {
    %c0 = arith.constant 0 : index
    %c0_0 = arith.constant 0 : index
    %0 = vector.load %arg6[%c0, %c0_0] : memref<9x256xf32, #tpu.memory_space<vmem>>, vector<1x256xf32>
    %c1 = arith.constant 1 : index
    %c0_1 = arith.constant 0 : index
    %1 = vector.load %arg6[%c1, %c0_1] : memref<9x256xf32, #tpu.memory_space<vmem>>, vector<1x256xf32>
    %c2 = arith.constant 2 : index
    %c0_2 = arith.constant 0 : index
    %2 = vector.load %arg6[%c2, %c0_2] : memref<9x256xf32, #tpu.memory_space<vmem>>, vector<1x256xf32>
    %c3 = arith.constant 3 : index
    %c0_3 = arith.constant 0 : index
    %3 = vector.load %arg6[%c3, %c0_3] : memref<9x256xf32, #tpu.memory_space<vmem>>, vector<1x256xf32>
    %c5 = arith.constant 5 : index
    %c0_4 = arith.constant 0 : index
    %4 = vector.load %arg6[%c5, %c0_4] : memref<9x256xf32, #tpu.memory_space<vmem>>, vector<1x256xf32>
    %c6 = arith.constant 6 : index
    %c0_5 = arith.constant 0 : index
    %5 = vector.load %arg6[%c6, %c0_5] : memref<9x256xf32, #tpu.memory_space<vmem>>, vector<1x256xf32>
    %c7 = arith.constant 7 : index
    %c0_6 = arith.constant 0 : index
    %6 = vector.load %arg6[%c7, %c0_6] : memref<9x256xf32, #tpu.memory_space<vmem>>, vector<1x256xf32>
    %c8 = arith.constant 8 : index
    %c0_7 = arith.constant 0 : index
    %7 = vector.load %arg6[%c8, %c0_7] : memref<9x256xf32, #tpu.memory_space<vmem>>, vector<1x256xf32>
    %c0_8 = arith.constant 0 : index
    %c0_9 = arith.constant 0 : index
    %c0_10 = arith.constant 0 : index
    %8 = vector.load %arg1[%c0_8, %c0_9, %c0_10] : memref<1x8x256xf32, #tpu.memory_space<vmem>>, vector<1x8x256xf32>
    %9 = vector.shape_cast %8 : vector<1x8x256xf32> to vector<8x256xf32>
    %c0_11 = arith.constant 0 : index
    %c0_12 = arith.constant 0 : index
    %10 = vector.load %arg2[%c0_11, %c0_12] : memref<8x72xf32, #tpu.memory_space<vmem>>, vector<8x72xf32>
    %c17_i32 = arith.constant 17 : i32
    %11 = tpu.dynamic_rotate %9 by %c17_i32 dim 1 : vector<8x256xf32>, i32 -> vector<8x256xf32>
    %12 = vector.broadcast %0 : vector<1x256xf32> to vector<8x256xf32>
    %13 = arith.mulf %11, %12 : vector<8x256xf32>
    %c16_i32 = arith.constant 16 : i32
    %14 = tpu.dynamic_rotate %9 by %c16_i32 dim 1 : vector<8x256xf32>, i32 -> vector<8x256xf32>
    %15 = vector.broadcast %1 : vector<1x256xf32> to vector<8x256xf32>
    %16 = arith.mulf %14, %15 : vector<8x256xf32>
    %c15_i32 = arith.constant 15 : i32
    %17 = tpu.dynamic_rotate %9 by %c15_i32 dim 1 : vector<8x256xf32>, i32 -> vector<8x256xf32>
    %18 = vector.broadcast %2 : vector<1x256xf32> to vector<8x256xf32>
    %19 = arith.mulf %17, %18 : vector<8x256xf32>
    %c1_i32 = arith.constant 1 : i32
    %20 = tpu.dynamic_rotate %9 by %c1_i32 dim 1 : vector<8x256xf32>, i32 -> vector<8x256xf32>
    %21 = vector.broadcast %3 : vector<1x256xf32> to vector<8x256xf32>
    %22 = arith.mulf %20, %21 : vector<8x256xf32>
    %c255_i32 = arith.constant 255 : i32
    %23 = tpu.dynamic_rotate %9 by %c255_i32 dim 1 : vector<8x256xf32>, i32 -> vector<8x256xf32>
    %24 = vector.broadcast %4 : vector<1x256xf32> to vector<8x256xf32>
    %25 = arith.mulf %23, %24 : vector<8x256xf32>
    %c241_i32 = arith.constant 241 : i32
    %26 = tpu.dynamic_rotate %9 by %c241_i32 dim 1 : vector<8x256xf32>, i32 -> vector<8x256xf32>
    %27 = vector.broadcast %5 : vector<1x256xf32> to vector<8x256xf32>
    %28 = arith.mulf %26, %27 : vector<8x256xf32>
    %c240_i32 = arith.constant 240 : i32
    %29 = tpu.dynamic_rotate %9 by %c240_i32 dim 1 : vector<8x256xf32>, i32 -> vector<8x256xf32>
    %30 = vector.broadcast %6 : vector<1x256xf32> to vector<8x256xf32>
    %31 = arith.mulf %29, %30 : vector<8x256xf32>
    %c239_i32 = arith.constant 239 : i32
    %32 = tpu.dynamic_rotate %9 by %c239_i32 dim 1 : vector<8x256xf32>, i32 -> vector<8x256xf32>
    %33 = vector.broadcast %7 : vector<1x256xf32> to vector<8x256xf32>
    %34 = arith.mulf %32, %33 : vector<8x256xf32>
    %35 = tpu.concatenate %13, %16, %19, %22, %9, %25, %28, %31, %34 in 0 : vector<8x256xf32>, vector<8x256xf32>, vector<8x256xf32>, vector<8x256xf32>, vector<8x256xf32>, vector<8x256xf32>, vector<8x256xf32>, vector<8x256xf32>, vector<8x256xf32> -> vector<72x256xf32>
    %cst = arith.constant dense<0.000000e+00> : vector<8x256xf32>
    %36 = tpu.matmul %10, %35, %cst {dimension_numbers = #tpu.dot_dimension_numbers<[1], [0], [0], [1], [0, 0, 1, 1], [], []>} : vector<8x72xf32>, vector<72x256xf32>, vector<8x256xf32> -> vector<8x256xf32>
    %c0_13 = arith.constant 0 : index
    %c0_14 = arith.constant 0 : index
    %37 = vector.load %arg3[%c0_13, %c0_14] : memref<8x1xf32, #tpu.memory_space<vmem>>, vector<8x1xf32>
    %38 = vector.broadcast %37 : vector<8x1xf32> to vector<8x256xf32>
    %39 = arith.addf %36, %38 : vector<8x256xf32>
    %cst_15 = arith.constant 0.000000e+00 : f32
    %40 = vector.broadcast %cst_15 : f32 to vector<8x256xf32>
    %41 = arith.maximumf %39, %40 : vector<8x256xf32>
    %c0_16 = arith.constant 0 : index
    %c0_17 = arith.constant 0 : index
    %42 = vector.load %arg4[%c0_16, %c0_17] : memref<8x72xf32, #tpu.memory_space<vmem>>, vector<8x72xf32>
    %c17_i32_18 = arith.constant 17 : i32
    %43 = tpu.dynamic_rotate %41 by %c17_i32_18 dim 1 : vector<8x256xf32>, i32 -> vector<8x256xf32>
    %44 = vector.broadcast %0 : vector<1x256xf32> to vector<8x256xf32>
    %45 = arith.mulf %43, %44 : vector<8x256xf32>
    %c16_i32_19 = arith.constant 16 : i32
    %46 = tpu.dynamic_rotate %41 by %c16_i32_19 dim 1 : vector<8x256xf32>, i32 -> vector<8x256xf32>
    %47 = vector.broadcast %1 : vector<1x256xf32> to vector<8x256xf32>
    %48 = arith.mulf %46, %47 : vector<8x256xf32>
    %c15_i32_20 = arith.constant 15 : i32
    %49 = tpu.dynamic_rotate %41 by %c15_i32_20 dim 1 : vector<8x256xf32>, i32 -> vector<8x256xf32>
    %50 = vector.broadcast %2 : vector<1x256xf32> to vector<8x256xf32>
    %51 = arith.mulf %49, %50 : vector<8x256xf32>
    %c1_i32_21 = arith.constant 1 : i32
    %52 = tpu.dynamic_rotate %41 by %c1_i32_21 dim 1 : vector<8x256xf32>, i32 -> vector<8x256xf32>
    %53 = vector.broadcast %3 : vector<1x256xf32> to vector<8x256xf32>
    %54 = arith.mulf %52, %53 : vector<8x256xf32>
    %c255_i32_22 = arith.constant 255 : i32
    %55 = tpu.dynamic_rotate %41 by %c255_i32_22 dim 1 : vector<8x256xf32>, i32 -> vector<8x256xf32>
    %56 = vector.broadcast %4 : vector<1x256xf32> to vector<8x256xf32>
    %57 = arith.mulf %55, %56 : vector<8x256xf32>
    %c241_i32_23 = arith.constant 241 : i32
    %58 = tpu.dynamic_rotate %41 by %c241_i32_23 dim 1 : vector<8x256xf32>, i32 -> vector<8x256xf32>
    %59 = vector.broadcast %5 : vector<1x256xf32> to vector<8x256xf32>
    %60 = arith.mulf %58, %59 : vector<8x256xf32>
    %c240_i32_24 = arith.constant 240 : i32
    %61 = tpu.dynamic_rotate %41 by %c240_i32_24 dim 1 : vector<8x256xf32>, i32 -> vector<8x256xf32>
    %62 = vector.broadcast %6 : vector<1x256xf32> to vector<8x256xf32>
    %63 = arith.mulf %61, %62 : vector<8x256xf32>
    %c239_i32_25 = arith.constant 239 : i32
    %64 = tpu.dynamic_rotate %41 by %c239_i32_25 dim 1 : vector<8x256xf32>, i32 -> vector<8x256xf32>
    %65 = vector.broadcast %7 : vector<1x256xf32> to vector<8x256xf32>
    %66 = arith.mulf %64, %65 : vector<8x256xf32>
    %67 = tpu.concatenate %45, %48, %51, %54, %41, %57, %60, %63, %66 in 0 : vector<8x256xf32>, vector<8x256xf32>, vector<8x256xf32>, vector<8x256xf32>, vector<8x256xf32>, vector<8x256xf32>, vector<8x256xf32>, vector<8x256xf32>, vector<8x256xf32> -> vector<72x256xf32>
    %cst_26 = arith.constant dense<0.000000e+00> : vector<8x256xf32>
    %68 = tpu.matmul %42, %67, %cst_26 {dimension_numbers = #tpu.dot_dimension_numbers<[1], [0], [0], [1], [0, 0, 1, 1], [], []>} : vector<8x72xf32>, vector<72x256xf32>, vector<8x256xf32> -> vector<8x256xf32>
    %c0_27 = arith.constant 0 : index
    %c0_28 = arith.constant 0 : index
    %69 = vector.load %arg5[%c0_27, %c0_28] : memref<8x1xf32, #tpu.memory_space<vmem>>, vector<8x1xf32>
    %70 = vector.broadcast %69 : vector<8x1xf32> to vector<8x256xf32>
    %71 = arith.addf %68, %70 : vector<8x256xf32>
    %cst_29 = arith.constant 0.000000e+00 : f32
    %72 = vector.broadcast %cst_29 : f32 to vector<8x256xf32>
    %73 = arith.maximumf %71, %72 : vector<8x256xf32>
    %c0_30 = arith.constant 0 : index
    %c0_31 = arith.constant 0 : index
    %c0_32 = arith.constant 0 : index
    %74 = vector.load %arg7[%c0_30, %c0_31, %c0_32] : memref<1x8x256xf32, #tpu.memory_space<vmem>>, vector<1x8x256xf32>
    %75 = vector.shape_cast %74 : vector<1x8x256xf32> to vector<8x256xf32>
    %76 = vector.shape_cast %73 : vector<8x256xf32> to vector<1x8x256xf32>
    tpu.vector_store %arg7[%c0_30, %c0_31, %c0_32], %76 {strides = array<i32>} : memref<1x8x256xf32, #tpu.memory_space<vmem>>, vector<1x8x256xf32>,
    return
  }
  func.func @transform_0(%arg0: i32) -> (i32, i32, i32) {
    %c0_i32 = arith.constant 0 : i32
    %c0_i32_0 = arith.constant 0 : i32
    %c0_i32_1 = arith.constant 0 : i32
    return %arg0, %c0_i32, %c0_i32_0 : i32, i32, i32
  }
  func.func @transform_1(%arg0: i32) -> (i32, i32) {
    %c0_i32 = arith.constant 0 : i32
    %c0_i32_0 = arith.constant 0 : i32
    %c0_i32_1 = arith.constant 0 : i32
    return %c0_i32, %c0_i32_0 : i32, i32
  }
  func.func @transform_2(%arg0: i32) -> (i32, i32) {
    %c0_i32 = arith.constant 0 : i32
    %c0_i32_0 = arith.constant 0 : i32
    %c0_i32_1 = arith.constant 0 : i32
    return %c0_i32, %c0_i32_0 : i32, i32
  }
  func.func @transform_3(%arg0: i32) -> (i32, i32) {
    %c0_i32 = arith.constant 0 : i32
    %c0_i32_0 = arith.constant 0 : i32
    %c0_i32_1 = arith.constant 0 : i32
    return %c0_i32, %c0_i32_0 : i32, i32
  }
  func.func @transform_4(%arg0: i32) -> (i32, i32) {
    %c0_i32 = arith.constant 0 : i32
    %c0_i32_0 = arith.constant 0 : i32
    %c0_i32_1 = arith.constant 0 : i32
    return %c0_i32, %c0_i32_0 : i32, i32
  }
  func.func @transform_5(%arg0: i32) -> (i32, i32) {
    %c0_i32 = arith.constant 0 : i32
    %c0_i32_0 = arith.constant 0 : i32
    %c0_i32_1 = arith.constant 0 : i32
    return %c0_i32, %c0_i32_0 : i32, i32
  }
  func.func @transform_6(%arg0: i32) -> (i32, i32, i32) {
    %c0_i32 = arith.constant 0 : i32
    %c0_i32_0 = arith.constant 0 : i32
    %c0_i32_1 = arith.constant 0 : i32
    return %arg0, %c0_i32, %c0_i32_0 : i32, i32, i32
  }
}

</mosaic_0001>

<bundles_post_ra>
// kernel: unet_conv_block.1
= control target key start
LH: loop header
LB: loop body
LE: loop exit
PB: predicated region body
PF: predicated region fallthrough
CT: control target
= control target key end

     0   :  { %s704_s21 = smov 0   ;;  %s992_s0 = inlined_call_operand.vmem [shape: f32[2,8,256], index: 0, kind: input, shape index: {}]   ;;  %s993_s1 = inlined_call_operand.vmem [shape: f32[8,72], index: 1, kind: input, shape index: {}]   ;;  %s994_s2 = inlined_call_operand.vmem [shape: f32[8,1], index: 2, kind: input, shape index: {}]   ;;  %s995_s3 = inlined_call_operand.vmem [shape: f32[8,72], index: 3, kind: input, shape index: {}]   ;;  %s996_s4 = inlined_call_operand.vmem [shape: f32[8,1], index: 4, kind: input, shape index: {}]   ;;  %s997_s5 = inlined_call_operand.vmem [shape: f32[9,256], index: 5, kind: input, shape index: {}]   ;;  %s998_s6 = inlined_call_operand.vmem [shape: f32[2,8,256], index: 6, kind: output, shape index: {}]  }
   0x1 LB: > { %s609_s22 = sadd.s32 4294967295, %s658_s21   ;;  %p613_p0 = scmp.ge.s32.totalorder %s658_s21, 1  ;;  %s658_s21 = sphi %s704_s21, %s16_s21  }
   0x2   : > { %p212_p1 = scmp.lt.s32.totalorder %s658_s21, 3 }
   0x4   : > { %p213_p2 = pnand %p613_p0, %p212_p1 }
   0x5   : > { %p242_p3 = scmp.lt.s32.totalorder (!%p213_p2), %s609_s22, 1  ;;  %s660_s27 = smov (!%p213_p2), 112  }
   0x6   : > { %216 = sbr.rel (%p213_p2) target bundleno = 596 (0x254), region = 44  ;;  %s661_s28 = smov (!%p213_p2), 111  }
   0x7   : > { %s662_s29 = smov (!%p213_p2), 113   ;;  %s663_s30 = smov (!%p213_p2), 127  }
   0x8   : > { %s664_s7 = smov (!%p213_p2), 1   ;;  %s665_s8 = smov (!%p213_p2), 15  }
   0x9   : > { %s666_s9 = smov (!%p213_p2), 16   ;;  %s667_s10 = smov (!%p213_p2), 17  }
   0xb   : > { %s1000_s22 = smov (!%p242_p3, %s609_s22), 1  ;;  %v274_v3 = vlaneseq  ;;  %v761_v7 = vld [vmem:[%s997_s5 + $0x10] ss:$8 sm:$0x3]  ;;  %v384_v35 = vld [vmem:[%s994_s2] sm:$0xff]  ;;  %v668_v36 = vmov 0  }
   0xc   : > { %s631_s23 = sshll.u32 %s1000_s22, 4  ;;  %v766_v9 = vld [vmem:[%s997_s5 + $0x7] ss:$8 sm:$0x3]  ;;  %v378_v10 = vperm.slane %v761_v7, 0  ;;  %v379_v11 = vperm.slane %v761_v7, 1  ;;  %650 = vset.pattern.permute.xlu1 %v668_v36  ;;  %651 = vset.pattern.permute.xlu0 %v668_v36 }
   0xd   : > { %s246_s26 = scalar_lea.vmem %s992_s0, %s631_s23  ;;  %v756_v6 = vand.u32 127, %v274_v3  ;;  %v775_v12 = vld [vmem:[%s997_s5 + $0x6] ss:$8 sm:$0x3]  ;;  %v364_v15 = vperm.slane %v766_v9, 0  ;;  %v365_v16 = vperm.slane %v766_v9, 1 }
   0xe   : > { %v720_v0 = vld [vmem:[%s246_s26] sm:$0xff]  ;;  %v728_v1 = vld [vmem:[%s246_s26 + $0x8] sm:$0xff]  ;;  %v350_v23 = vperm.slane %v775_v12, 0  ;;  %v351_v24 = vperm.slane %v775_v12, 1  ;;  %vm390_vm8 = vcmask 588800  }
   0xf   : > { %356 = vrot.lane.b32.xlu1 %v720_v0, %s660_s27  ;;  %370 = vrot.lane.b32.xlu0 %v720_v0, %s661_s28  ;;  %vm360_vm0 = vcmp.lt.s32.totalorder %v756_v6, 112  ;;  %vm374_vm1 = vcmp.lt.s32.totalorder %v756_v6, 111  ;;  %vm346_vm2 = vcmp.lt.s32.totalorder %v756_v6, 113  ;;  %v801_v27 = vld [vmem:[%s997_s5 + $0x5] ss:$8 sm:$0x3] }
  0x10   : > { %342 = vrot.lane.b32.xlu2 %v720_v0, %s662_s29  ;;  %vm332_vm3 = vcmp.lt.s32.totalorder %v756_v6, 127  ;;  %v336_v33 = vperm.slane %v801_v27, 0  ;;  %v337_v34 = vperm.slane %v801_v27, 1  ;;  %v828_v43 = vld [vmem:[%s997_s5 + $0x3] ss:$8 sm:$0x3] }
  0x11   : > { %v833_v44 = vld [vmem:[%s997_s5 + $0x2] ss:$8 sm:$0x3]  ;;  %vm318_vm4 = vcmp.lt.s32.totalorder %v756_v6, 1  ;;  %v322_v45 = vperm.slane %v828_v43, 0  ;;  %v323_v46 = vperm.slane %v828_v43, 1 }
  0x12   : > { %vm304_vm5 = vcmp.lt.s32.totalorder %v756_v6, 15  ;;  %v308_v48 = vperm.slane %v833_v44, 0  ;;  %v309_v49 = vperm.slane %v833_v44, 1  ;;  %v862_v60 = vld [vmem:[%s997_s5 + $0x1] ss:$8 sm:$0x3] }
  0x13   : > { %vm290_vm6 = vcmp.lt.s32.totalorder %v756_v6, 16  ;;  %v294_v61 = vperm.slane %v862_v60, 0  ;;  %v295_v62 = vperm.slane %v862_v60, 1  ;;  %vm276_vm7 = vcmp.lt.s32.totalorder %v756_v6, 17  ;;  %v436_v6 = vld [vmem:[%s995_s3] sm:$0xff] }
  0x17   : > { %358 = vrot.lane.b32.xlu1 %v728_v1, %s660_s27  ;;  %372 = vrot.lane.b32.xlu0 %v728_v1, %s661_s28 }
  0x18   : > { %344 = vrot.lane.b32.xlu2 %v728_v1, %s662_s29 }
  0x1f   : > { %330 = vrot.lane.b32.xlu1 %v728_v1, %s663_s30  ;;  %328 = vrot.lane.b32.xlu0 %v720_v0, %s663_s30 }
  0x20   : > { %314 = vrot.lane.b32.xlu2 %v720_v0, %s664_s7 }
  0x27   : > { %300 = vrot.lane.b32.xlu1 %v720_v0, %s665_s8  ;;  %316 = vrot.lane.b32.xlu0 %v728_v1, %s664_s7 }
  0x28   : > { %302 = vrot.lane.b32.xlu2 %v728_v1, %s665_s8 }
  0x2f   : > { %288 = vrot.lane.b32.xlu1 %v728_v1, %s666_s9  ;;  %286 = vrot.lane.b32.xlu0 %v720_v0, %s666_s9 }
  0x30   : > { %270 = vrot.lane.b32.xlu2 %v720_v0, %s667_s10 }
  0x37   : > { %272 = vrot.lane.b32.xlu0 %v728_v1, %s667_s10  ;;  %387 = vperm.xlu1 %650, %v384_v35  }
  0x6a   : > { %v343_v2 = vpop.permute.xlu2 %342 }
  0x72   : > { %v345_v8 = vpop.permute.xlu2 %344 }
  0x73   : > { %v347_v25 = vsel %vm346_vm2, %v343_v2, %v345_v8  ;;  %v348_v26 = vsel %vm346_vm2, %v345_v8, %v343_v2 }
  0x74   : > { %v354_v31 = vmul.f32 %v350_v23, %v347_v25  ;;  %v355_v32 = vmul.f32 %v351_v24, %v348_v26 }
  0x7a   : > { %v315_v30 = vpop.permute.xlu2 %314 }
  0x81   : > { %v357_v4 = vpop.permute.xlu1 %356  ;;  %v371_v5 = vpop.permute.xlu0 %370 }
  0x82   : > { %v303_v47 = vpop.permute.xlu2 %302 }
  0x89   : > { %v359_v13 = vpop.permute.xlu1 %358  ;;  %v373_v14 = vpop.permute.xlu0 %372 }
  0x8a   : > { %v361_v17 = vsel %vm360_vm0, %v357_v4, %v359_v13  ;;  %v362_v18 = vsel %vm360_vm0, %v359_v13, %v357_v4  ;;  %v375_v19 = vsel %vm374_vm1, %v371_v5, %v373_v14  ;;  %v376_v20 = vsel %vm374_vm1, %v373_v14, %v371_v5  ;;  %v878_v5 = vld [vmem:[%s997_s5] ss:$8 sm:$0x3]  ;;  %v271_v8 = vpop.permute.xlu2 %270 }
  0x8b   : > { %v382_v21 = vmul.f32 %v378_v10, %v375_v19  ;;  %v383_v22 = vmul.f32 %v379_v11, %v376_v20  ;;  %v368_v28 = vmul.f32 %v364_v15, %v361_v17  ;;  %v369_v29 = vmul.f32 %v365_v16, %v362_v18 }
  0x8c   : > { %v280_v13 = vperm.slane %v878_v5, 0  ;;  %v281_v14 = vperm.slane %v878_v5, 1 }
  0x8d   : > { %401 = vmatpush.msra.mxu0 %v382_v21  ;;  %421 = vmatpush.msra.mxu1 %v383_v22  ;;  %v269_v22 = vld [vmem:[%s993_s1] sm:$0xff] }
  0x8f   : > { %402 = vmatpush.msra.mxu0 %v368_v28  ;;  %422 = vmatpush.msra.mxu1 %v369_v29 }
  0x91   : > { %v331_v37 = vpop.permute.xlu1 %330  ;;  %403 = vmatpush.msra.mxu0 %v354_v31  ;;  %423 = vmatpush.msra.mxu1 %v355_v32  ;;  %v329_v38 = vpop.permute.xlu0 %328 }
  0x92   : > { %v333_v39 = vsel %vm332_vm3, %v329_v38, %v331_v37  ;;  %v334_v40 = vsel %vm332_vm3, %v331_v37, %v329_v38 }
  0x93   : > { %v340_v41 = vmul.f32 %v336_v33, %v333_v39  ;;  %v341_v42 = vmul.f32 %v337_v34, %v334_v40 }
  0x95   : > { %404 = vmatpush.msra.mxu0 %v340_v41  ;;  %424 = vmatpush.msra.mxu1 %v341_v42 }
  0x97   : > { %405 = vmatpush.msra.mxu0 %v720_v0  ;;  %425 = vmatpush.msra.mxu1 %v728_v1 }
  0x99   : > { %v301_v50 = vpop.permute.xlu1 %300  ;;  %v317_v51 = vpop.permute.xlu0 %316 }
  0x9a   : > { %v319_v52 = vsel %vm318_vm4, %v315_v30, %v317_v51  ;;  %v320_v53 = vsel %vm318_vm4, %v317_v51, %v315_v30  ;;  %v305_v54 = vsel %vm304_vm5, %v301_v50, %v303_v47  ;;  %v306_v55 = vsel %vm304_vm5, %v303_v47, %v301_v50 }
  0x9b   : > { %v326_v56 = vmul.f32 %v322_v45, %v320_v53  ;;  %v327_v57 = vmul.f32 %v323_v46, %v319_v52  ;;  %v312_v58 = vmul.f32 %v308_v48, %v306_v55  ;;  %v313_v59 = vmul.f32 %v309_v49, %v305_v54  ;;  %v501_v55 = vld [vmem:[%s996_s4] sm:$0xff] }
  0x9d   : > { %406 = vmatpush.msra.mxu0 %v326_v56  ;;  %426 = vmatpush.msra.mxu1 %v327_v57 }
  0x9f   : > { %407 = vmatpush.msra.mxu0 %v312_v58  ;;  %427 = vmatpush.msra.mxu1 %v313_v59 }
  0xa1   : > { %v289_v63 = vpop.permute.xlu1 %288  ;;  %v287_v0 = vpop.permute.xlu0 %286 }
  0xa2   : > { %v291_v1 = vsel %vm290_vm6, %v287_v0, %v289_v63  ;;  %v292_v2 = vsel %vm290_vm6, %v289_v63, %v287_v0 }
  0xa3   : > { %v298_v3 = vmul.f32 %v294_v61, %v292_v2  ;;  %v299_v4 = vmul.f32 %v295_v62, %v291_v1 }
  0xa5   : > { %408 = vmatpush.msra.mxu0 %v298_v3  ;;  %428 = vmatpush.msra.mxu1 %v299_v4 }
  0xa9   : > { %v273_v17 = vpop.permute.xlu0 %272  ;;  %v388_v25 = vpop.permute.xlu1 %387 }
  0xaa   : > { %v277_v18 = vsel %vm276_vm7, %v271_v8, %v273_v17  ;;  %v278_v19 = vsel %vm276_vm7, %v273_v17, %v271_v8 }
  0xab   : > { %v284_v20 = vmul.f32 %v280_v13, %v278_v19  ;;  %v285_v21 = vmul.f32 %v281_v14, %v277_v18 }
  0xad   : > { %409 = vmatpush.msra.mxu0 %v284_v20  ;;  %429 = vmatpush.msra.mxu1 %v285_v21 }
  0xae   : > { %625 = vmatmul.msk.f32.vlgmr.msra.gmra.mxu0 %vm390_vm8, %v269_v22  ;;  %626 = vmatmul.msk.f32.vlgmr.msra.gmra.mxu1 %vm390_vm8, %v269_v22 }
 0x12b   : > { %v411_v26 = vpop.f32.mrf.mxu0  ;;  %v431_v28 = vpop.f32.mrf.mxu1 }
 0x12c   : > { %v412_v29 = vadd.f32 %v411_v26, %v388_v25  ;;  %v432_v30 = vadd.f32 %v431_v28, %v388_v25 }
 0x12e   : > { %v434_v31 = vmax.f32 %v412_v29, 0.0  ;;  %v435_v32 = vmax.f32 %v432_v30, 0.0 }
 0x130   : > { %485 = vrot.lane.b32.xlu1 %v434_v31, %s660_s27  ;;  %493 = vrot.lane.b32.xlu2 %v434_v31, %s661_s28 }
 0x131   : > { %495 = vrot.lane.b32.xlu0 %v435_v32, %s661_s28 }
 0x138   : > { %479 = vrot.lane.b32.xlu1 %v435_v32, %s662_s29  ;;  %487 = vrot.lane.b32.xlu2 %v435_v32, %s660_s27 }
 0x139   : > { %477 = vrot.lane.b32.xlu0 %v434_v31, %s662_s29 }
 0x140   : > { %461 = vrot.lane.b32.xlu1 %v434_v31, %s664_s7  ;;  %469 = vrot.lane.b32.xlu2 %v434_v31, %s663_s30 }
 0x141   : > { %471 = vrot.lane.b32.xlu0 %v435_v32, %s663_s30 }
 0x148   : > { %455 = vrot.lane.b32.xlu1 %v435_v32, %s665_s8  ;;  %463 = vrot.lane.b32.xlu2 %v435_v32, %s664_s7 }
 0x149   : > { %453 = vrot.lane.b32.xlu0 %v434_v31, %s665_s8 }
 0x150   : > { %437 = vrot.lane.b32.xlu1 %v434_v31, %s667_s10  ;;  %445 = vrot.lane.b32.xlu2 %v434_v31, %s666_s9 }
 0x151   : > { %447 = vrot.lane.b32.xlu0 %v435_v32, %s666_s9  ;;  %s251_s9 = scalar_lea.vmem %s998_s6, %s631_s23 }
 0x158   : > { %439 = vrot.lane.b32.xlu2 %v435_v32, %s667_s10 }
 0x159   : > { %504 = vperm.xlu0 %651, %v501_v55  }
 0x18a   : > { %v494_v35 = vpop.permute.xlu2 %493 }
 0x192   : > { %v488_v36 = vpop.permute.xlu2 %487 }
 0x19a   : > { %v470_v47 = vpop.permute.xlu2 %469 }
 0x1a2   : > { %v486_v37 = vpop.permute.xlu1 %485 }
 0x1a3   : > { %v496_v38 = vpop.permute.xlu0 %495  ;;  %v489_v39 = vsel %vm360_vm0, %v486_v37, %v488_v36  ;;  %v490_v40 = vsel %vm360_vm0, %v488_v36, %v486_v37 }
 0x1a4   : > { %v497_v41 = vsel %vm374_vm1, %v494_v35, %v496_v38  ;;  %v498_v42 = vsel %vm374_vm1, %v496_v38, %v494_v35  ;;  %v491_v52 = vmul.f32 %v489_v39, %v364_v15  ;;  %v492_v53 = vmul.f32 %v490_v40, %v365_v16  ;;  %v464_v15 = vpop.permute.xlu2 %463 }
 0x1a5   : > { %v499_v50 = vmul.f32 %v497_v41, %v378_v10  ;;  %v500_v51 = vmul.f32 %v498_v42, %v379_v11 }
 0x1a7   : > { %517 = vmatpush.msra.mxu2 %v499_v50  ;;  %537 = vmatpush.msra.mxu3 %v500_v51 }
 0x1a9   : > { %518 = vmatpush.msra.mxu2 %v491_v52  ;;  %538 = vmatpush.msra.mxu3 %v492_v53 }
 0x1aa   : > { %v480_v54 = vpop.permute.xlu1 %479 }
 0x1ab   : > { %v478_v56 = vpop.permute.xlu0 %477 }
 0x1ac   : > { %v481_v7 = vsel %vm346_vm2, %v478_v56, %v480_v54  ;;  %v482_v10 = vsel %vm346_vm2, %v480_v54, %v478_v56  ;;  %v446_v0 = vpop.permute.xlu2 %445 }
 0x1ad   : > { %v483_v11 = vmul.f32 %v481_v7, %v350_v23  ;;  %v484_v9 = vmul.f32 %v482_v10, %v351_v24 }
 0x1af   : > { %519 = vmatpush.msra.mxu2 %v483_v11  ;;  %539 = vmatpush.msra.mxu3 %v484_v9 }
 0x1b2   : > { %v462_v16 = vpop.permute.xlu1 %461 }
 0x1b3   : > { %v472_v57 = vpop.permute.xlu0 %471  ;;  %v465_v12 = vsel %vm318_vm4, %v462_v16, %v464_v15  ;;  %v466_v24 = vsel %vm318_vm4, %v464_v15, %v462_v16 }
 0x1b4   : > { %v473_v58 = vsel %vm332_vm3, %v470_v47, %v472_v57  ;;  %v474_v59 = vsel %vm332_vm3, %v472_v57, %v470_v47  ;;  %v467_v1 = vmul.f32 %v466_v24, %v322_v45  ;;  %v440_v45 = vpop.permute.xlu2 %439 }
 0x1b5   : > { %v475_v63 = vmul.f32 %v473_v58, %v336_v33  ;;  %v476_v23 = vmul.f32 %v474_v59, %v337_v34  ;;  %v468_v33 = vmul.f32 %v465_v12, %v323_v46 }
 0x1b7   : > { %520 = vmatpush.msra.mxu2 %v475_v63  ;;  %540 = vmatpush.msra.mxu3 %v476_v23 }
 0x1b9   : > { %521 = vmatpush.msra.mxu2 %v434_v31  ;;  %541 = vmatpush.msra.mxu3 %v435_v32 }
 0x1ba   : > { %v456_v2 = vpop.permute.xlu1 %455 }
 0x1bb   : > { %522 = vmatpush.msra.mxu2 %v467_v1  ;;  %542 = vmatpush.msra.mxu3 %v468_v33  ;;  %v454_v27 = vpop.permute.xlu0 %453 }
 0x1bc   : > { %v457_v34 = vsel %vm304_vm5, %v454_v27, %v456_v2  ;;  %v458_v3 = vsel %vm304_vm5, %v456_v2, %v454_v27 }
 0x1bd   : > { %v459_v4 = vmul.f32 %v458_v3, %v308_v48  ;;  %v460_v8 = vmul.f32 %v457_v34, %v309_v49 }
 0x1bf   : > { %523 = vmatpush.msra.mxu2 %v459_v4  ;;  %543 = vmatpush.msra.mxu3 %v460_v8 }
 0x1c2   : > { %v438_v43 = vpop.permute.xlu1 %437 }
 0x1c3   : > { %v448_v46 = vpop.permute.xlu0 %447  ;;  %v441_v17 = vsel %vm276_vm7, %v438_v43, %v440_v45  ;;  %v442_v18 = vsel %vm276_vm7, %v440_v45, %v438_v43 }
 0x1c4   : > { %v449_v19 = vsel %vm290_vm6, %v446_v0, %v448_v46  ;;  %v450_v48 = vsel %vm290_vm6, %v448_v46, %v446_v0  ;;  %v443_v20 = vmul.f32 %v442_v18, %v280_v13  ;;  %v444_v21 = vmul.f32 %v441_v17, %v281_v14 }
 0x1c5   : > { %v451_v44 = vmul.f32 %v450_v48, %v294_v61  ;;  %v452_v49 = vmul.f32 %v449_v19, %v295_v62 }
 0x1c7   : > { %524 = vmatpush.msra.mxu2 %v451_v44  ;;  %544 = vmatpush.msra.mxu3 %v452_v49 }
 0x1c9   : > { %525 = vmatpush.msra.mxu2 %v443_v20  ;;  %545 = vmatpush.msra.mxu3 %v444_v21 }
 0x1ca   : > { %627 = vmatmul.msk.f32.vlgmr.msra.gmra.mxu2 %vm390_vm8, %v436_v6  ;;  %628 = vmatmul.msk.f32.vlgmr.msra.gmra.mxu3 %vm390_vm8, %v436_v6 }
 0x1cb   : > { %v505_v60 = vpop.permute.xlu0 %504 }
 0x24d   : > { %v527_v61 = vpop.f32.mrf.mxu2  ;;  %v547_v62 = vpop.f32.mrf.mxu3 }
 0x24e   : > { %v528_v22 = vadd.f32 %v527_v61, %v505_v60  ;;  %v548_v25 = vadd.f32 %v547_v62, %v505_v60 }
 0x250   : > { %v550_v5 = vmax.f32 %v528_v22, 0.0  ;;  %v551_v13 = vmax.f32 %v548_v25, 0.0 }
 0x252   : > { %552 = vst [vmem:[%s251_s9] sm:$0xff] %v550_v5 }
 0x253   : > { %553 = vst [vmem:[%s251_s9 + $0x8] sm:$0xff] %v551_v13 }
 0x254 PF: > { %s16_s21 = sadd.s32 1, %s658_s21  }
 0x255   : > { %p13_p4 = scmp.ge.s32.totalorder %s16_s21, 4  }
 0x257   :  { %15 = sbr.rel (!%p13_p4) target bundleno = 1 (0x1), region = 81 }

</bundles_post_ra>
